<compile_context>
chip_gen: v7x
topology: tpu7x:2x2x1
jax: 0.10.0
libtpu: 0.0.40
codegen_flags: <defaults>
</compile_context>

<pallas_src>
import math

import jax
import jax.numpy as jnp
import numpy as np
from jax import lax
from jax.experimental import pallas as pl
from jax.experimental.pallas import tpu as pltpu


def _make_attn_kernel(scale: float, mode: str, mask_batched: bool, TQ: int, TK: int):
    """Flash-style attention body for one (batch, q-tile, k-tile) grid step.

    mode: "none"   - no mask at all
          "causal" - structural lower-triangular mask derived in-kernel (no HBM mask)
          "dense"  - int8 mask tiles streamed from HBM (batch dim kept un-broadcast)
    """
    dense = mode == "dense"

    def kernel(*refs):
        if dense:
            ts_ref, q_ref, k_ref, v_ref, mask_ref, o_ref, m_sc, l_sc, acc_sc, q_sc = refs
        else:
            ts_ref, q_ref, k_ref, v_ref, o_ref, m_sc, l_sc, acc_sc, q_sc = refs
            mask_ref = None

        b = pl.program_id(0)
        iq = pl.program_id(1)
        kv = pl.program_id(2)
        nk = pl.num_programs(2)

        @pl.when(kv == 0)
        def _init():
            m_sc[...] = jnp.full_like(m_sc, -jnp.inf)
            l_sc[...] = jnp.zeros_like(l_sc)
            acc_sc[...] = jnp.zeros_like(acc_sc)
            # Hoist the 1/sqrt(d_k) scaling out of the kv loop: fold it once into the
            # small (TQ, D) q tile, kept in q's native dtype so bf16 feeds the MXU.
            q_sc[...] = q_ref[0] * scale

        def step(apply_mask):
            q = q_sc[...]                          # (TQ, D)   pre-scaled
            k = k_ref[0]                           # (TK, D)
            # scores = q @ k^T -- NT contraction, f32 accumulation, no explicit k.T.
            s = lax.dot_general(q, k, (((1,), (1,)), ((), ())),
                                preferred_element_type=jnp.float32)   # (TQ, TK) f32
            keep = None
            if apply_mask:
                if dense:
                    keep = mask_ref[0] != 0        # (TQ, TK), nonzero = attend
                else:  # structural causal mask: zero HBM mask traffic
                    row = lax.broadcasted_iota(jnp.int32, (TQ, TK), 0) + iq * TQ
                    col = lax.broadcasted_iota(jnp.int32, (TQ, TK), 1) + kv * TK
                    keep = row >= col
                s = jnp.where(keep, s, -1e30)

            # Online (flash) softmax update, all f32.
            m_prev = m_sc[...]
            m_new = jnp.maximum(m_prev, jnp.max(s, axis=-1, keepdims=True))
            alpha = jnp.exp(m_prev - m_new)
            p = jnp.exp(s - m_new)                 # (TQ, TK) f32
            if apply_mask:
                # Keep masked probabilities exactly zero so masked entries never
                # contribute; a fully-masked *row* then yields 0/0 at finalize,
                # matching PyTorch masked_fill(-inf) + softmax behaviour.
                p = jnp.where(keep, p, jnp.float32(0.0))

            l_sc[...] = alpha * l_sc[...] + jnp.sum(p, axis=-1, keepdims=True)
            acc_sc[...] = alpha * acc_sc[...] + jnp.dot(
                p.astype(v_ref.dtype), v_ref[0], preferred_element_type=jnp.float32)
            m_sc[...] = m_new

        if mode == "none":
            step(False)
        else:
            # Block-sparse tile skipping via the scalar-prefetched 3-state flag:
            #   0 = fully masked -> skip, 1 = partial -> mask, 2 = fully kept -> no mask.
            nq = pl.num_programs(1)
            bm = b if mask_batched else 0
            state = ts_ref[(bm * nq + iq) * nk + kv]

            @pl.when(state == 1)
            def _partial():
                step(True)

            @pl.when(state == 2)
            def _full():
                step(False)

        @pl.when(kv == nk - 1)
        def _finalize():
            # Exact reciprocal: runs once per (TQ, 1) vector -> approx saves nothing.
            inv_l = pl.reciprocal(l_sc[...], approx=False)
            o_ref[0] = (acc_sc[...] * inv_l).astype(o_ref.dtype)

    return kernel


def _sublane_align(dtype) -> int:
    return {4: 8, 2: 16, 1: 32}.get(jnp.dtype(dtype).itemsize, 8)


def _pick_tile(n: int, target: int, align: int) -> int:
    """Largest `align`-multiple tile <= target that divides n, else the full extent."""
    if n <= target:
        return n
    t = (target // align) * align
    while t >= align:
        if n % t == 0:
            return t
        t -= align
    return n


def scaled_dot_attention(q, k, v, mask=None, *, causal=False, tq=None, tk=None):
    """Pallas TPU scaled dot-product attention (ScaledDotAttention.forward).

    q: (B, Sq, D), k: (B, Sk, D), v: (B, Sk, Dv)
    mask: None, or bool/int array of shape (Sq, Sk), (1, Sq, Sk) or (B, Sq, Sk)
          (nonzero = attend).  A missing / size-1 batch dim is kept un-broadcast in HBM.
    causal=True: structural lower-triangular mask derived in-kernel (no mask array).
    Returns (B, Sq, Dv) in q.dtype.
    """
    if causal and mask is not None:
        raise ValueError("pass either `mask` or causal=True, not both")

    B, Sq, D = q.shape
    _, Sk, _ = k.shape
    Dv = v.shape[-1]

    mode = "causal" if causal else ("dense" if mask is not None else "none")

    # Tile sizes: big TQ cuts K/V re-reads (they are re-DMA'd Sq/TQ times), aligned to
    # the sublane packing of the dtypes in play; TK stays a multiple of 128 (lane dim).
    align_q = _sublane_align(q.dtype)
    if mode == "dense":
        align_q = max(align_q, 32)          # int8 mask sublane packing
    TQ = tq if tq is not None else _pick_tile(Sq, 512, align_q)
    TK = tk if tk is not None else _pick_tile(Sk, 512, 128)
    if Sq % TQ or Sk % TK:
        raise ValueError("tile sizes must divide the sequence lengths")

    # v7x megacore: prefer >= 2 parallel (batch, q-tile) work items over maximal TQ.
    if tq is None and B == 1 and Sq // TQ == 1 and Sq % (2 * align_q) == 0:
        TQ = Sq // 2

    nQ, nK = Sq // TQ, Sk // TK

    # --- per-tile 3-state flags (scalar prefetch) + mask plumbing -----------------
    mask_batched = False
    mask_arr = None
    if mode == "causal":
        ii = np.arange(nQ)[:, None] * TQ
        jj = np.arange(nK)[None, :] * TK
        full_tile = ii >= (jj + TK - 1)               # every q index >= every k index
        empty_tile = (ii + TQ - 1) < jj               # every q index <  every k index
        tstate = jnp.asarray(
            np.where(full_tile, 2, np.where(empty_tile, 0, 1)).astype(np.int32).reshape(-1))
    elif mode == "dense":
        m = jnp.asarray(mask)
        if m.ndim == 2:
            m = m[None]
        if m.ndim != 3 or m.shape[0] not in (1, B):
            raise ValueError("mask must be (Sq,Sk), (1,Sq,Sk) or (B,Sq,Sk)")
        Bm = m.shape[0]
        mask_batched = Bm > 1
        mb = jnp.broadcast_to(m, (Bm, Sq, Sk)) != 0   # NOT broadcast over batch
        mt = mb.reshape(Bm, nQ, TQ, nK, TK)
        all_ = jnp.all(mt, axis=(2, 4))
        any_ = jnp.any(mt, axis=(2, 4))
        tstate = jnp.where(all_, 2, jnp.where(any_, 1, 0)).astype(jnp.int32).reshape(-1)
        mask_arr = mb.astype(jnp.int8)                # 1 byte / element
    else:
        tstate = jnp.zeros((1,), jnp.int32)           # unused dummy prefetch arg

    kernel = _make_attn_kernel(1.0 / math.sqrt(D), mode, mask_batched, TQ, TK)

    in_specs = [
        pl.BlockSpec((1, TQ, D), lambda b, i, j, ts: (b, i, 0)),
        pl.BlockSpec((1, TK, D), lambda b, i, j, ts: (b, j, 0)),
        pl.BlockSpec((1, TK, Dv), lambda b, i, j, ts: (b, j, 0)),
    ]
    inputs = [q, k, v]
    if mode == "dense":
        if mask_batched:
            in_specs.append(pl.BlockSpec((1, TQ, TK), lambda b, i, j, ts: (b, i, j)))
        else:
            in_specs.append(pl.BlockSpec((1, TQ, TK), lambda b, i, j, ts: (0, i, j)))
        inputs.append(mask_arr)

    work = 0.5 if mode == "causal" else 1.0           # causal skips ~half the tiles
    bytes_accessed = (q.size * q.dtype.itemsize + k.size * k.dtype.itemsize +
                      v.size * v.dtype.itemsize + B * Sq * Dv * q.dtype.itemsize)
    if mode == "dense":
        bytes_accessed += mask_arr.size               # int8 mask, un-broadcast batch
    cost = pl.CostEstimate(
        flops=int(2 * B * Sq * Sk * (D + Dv) * work),
        transcendentals=int(B * Sq * Sk * work),
        bytes_accessed=int(bytes_accessed),
    )

    # TODO(synk): for d_v < 128 the output block is not lane-dense (masked vst);
    # packing several heads per call into a (TQ, H*Dv) output is a caller-layout change.
    return pl.pallas_call(
        kernel,
        out_shape=jax.ShapeDtypeStruct((B, Sq, Dv), q.dtype),
        grid_spec=pltpu.PrefetchScalarGridSpec(
            num_scalar_prefetch=1,
            grid=(B, nQ, nK),
            in_specs=in_specs,
            out_specs=pl.BlockSpec((1, TQ, Dv), lambda b, i, j, ts: (b, i, 0)),
            scratch_shapes=[
                pltpu.VMEM((TQ, 1), jnp.float32),     # running row max  m
                pltpu.VMEM((TQ, 1), jnp.float32),     # running denom    l
                pltpu.VMEM((TQ, Dv), jnp.float32),    # running output   acc
                pltpu.VMEM((TQ, D), q.dtype),         # pre-scaled q tile (hoisted)
            ],
        ),
        compiler_params=pltpu.CompilerParams(
            dimension_semantics=("parallel", "parallel", "arbitrary")),
        cost_estimate=cost,
    )(tstate, *inputs)


def _reference(q, k, v, mask=None, causal=False):
    d_k = q.shape[-1]
    qf, kf, vf = (x.astype(jnp.float32) for x in (q, k, v))
    scores = jnp.einsum("bqd,bkd->bqk", qf, kf) / math.sqrt(d_k)
    if causal:
        mask = jnp.tril(jnp.ones(scores.shape[-2:], dtype=bool))
    if mask is not None:
        scores = jnp.where(mask != 0, scores, -1e30)
    attn = jax.nn.softmax(scores, axis=-1)
    return jnp.einsum("bqk,bkd->bqd", attn, vf).astype(q.dtype)


if __name__ == "__main__":
    # Small shapes consistent with the module: batch=2, seq=8, d_model(d_k)=32.
    kq, kk, kvv = jax.random.split(jax.random.PRNGKey(0), 3)
    B, S, Dm = 2, 8, 32
    q = jax.random.normal(kq, (B, S, Dm), dtype=jnp.float32)
    k = jax.random.normal(kk, (B, S, Dm), dtype=jnp.float32)
    v = jax.random.normal(kvv, (B, S, Dm), dtype=jnp.float32)

    causal2d = jnp.tril(jnp.ones((S, S), dtype=bool))      # 2D mask -> Bm=1 (un-broadcast)

    out_plain = scaled_dot_attention(q, k, v)               # no-mask variant
    out_dense = scaled_dot_attention(q, k, v, causal2d)     # dense-mask variant (Bm=1)
    out_struct = scaled_dot_attention(q, k, v, causal=True) # structural causal (no HBM mask)

    # Tiled config exercising the online-softmax kv loop, bf16 MXU inputs, and all
    # three tile states (skip / partial / full) on a 2x2 tile grid per batch.
    B2, S2, D2 = 2, 256, 32
    kq2, kk2, kv2 = jax.random.split(jax.random.PRNGKey(1), 3)
    q2 = jax.random.normal(kq2, (B2, S2, D2), dtype=jnp.bfloat16)
    k2 = jax.random.normal(kk2, (B2, S2, D2), dtype=jnp.bfloat16)
    v2 = jax.random.normal(kv2, (B2, S2, D2), dtype=jnp.bfloat16)
    out_causal2 = scaled_dot_attention(q2, k2, v2, causal=True, tq=128, tk=128)

    # Per-batch key-padding mask (batched dense path, Bm = B, with tile skipping).
    lens = jnp.array([200, 120])
    pad_full = jnp.broadcast_to(
        jnp.arange(S2)[None, None, :] < lens[:, None, None], (B2, S2, S2))
    out_pad = scaled_dot_attention(q2, k2, v2, pad_full, tq=128, tk=128)

    jax.block_until_ready((out_plain, out_dense, out_struct, out_causal2, out_pad))

    ref_plain = _reference(q, k, v)
    ref_causal = _reference(q, k, v, causal=True)
    ref_causal2 = _reference(q2, k2, v2, causal=True)
    ref_pad = _reference(q2, k2, v2, pad_full)

    assert out_plain.shape == (B, S, Dm)
    assert jnp.allclose(out_plain, ref_plain, atol=1e-2, rtol=1e-2)
    assert jnp.allclose(out_dense, ref_causal, atol=1e-2, rtol=1e-2)
    assert jnp.allclose(out_struct, ref_causal, atol=1e-2, rtol=1e-2)
    assert jnp.allclose(out_causal2.astype(jnp.float32), ref_causal2.astype(jnp.float32),
                        atol=5e-2, rtol=5e-2)
    assert jnp.allclose(out_pad.astype(jnp.float32), ref_pad.astype(jnp.float32),
                        atol=5e-2, rtol=5e-2)

    # NOTE: fully-masked query rows yield l=0 -> 0/0 = NaN at finalize, intentionally
    # matching PyTorch masked_fill(-inf)+softmax on such rows.
    # TODO(synk): SCORE_SAVER.save(scores) is a visualization side-channel with no
    # Pallas equivalent; attention scores are never materialized outside the kernel.
    print("KERNEL_OK")
</pallas_src>

<mosaic_0001>
module attributes {stable_mosaic.version = 11 : i64} {
  func.func @kernel(%arg0: i32, %arg1: i32, %arg2: i32, %arg3: memref<1xi32, #tpu.memory_space<smem>>, %arg4: memref<1x8x32xf32, #tpu.memory_space<vmem>>, %arg5: memref<1x8x32xf32, #tpu.memory_space<vmem>>, %arg6: memref<1x8x32xf32, #tpu.memory_space<vmem>>, %arg7: memref<1x8x32xf32, #tpu.memory_space<vmem>>, %arg8: memref<8x1xf32, #tpu.memory_space<vmem>>, %arg9: memref<8x1xf32, #tpu.memory_space<vmem>>, %arg10: memref<8x32xf32, #tpu.memory_space<vmem>>, %arg11: memref<8x32xf32, #tpu.memory_space<vmem>>) attributes {dimension_semantics = [#tpu.dimension_semantics<parallel>, #tpu.dimension_semantics<parallel>, #tpu.dimension_semantics<arbitrary>], iteration_bounds = array<i64: 2, 1, 1>, scalar_prefetch = 1 : i64, scratch_operands = 4 : i64, tpu.core_type = #tpu.core_type<tc>, window_params = [{transform_indices = @transform_0, window_bounds = array<i64: 1, 8, 32>}, {transform_indices = @transform_1, window_bounds = array<i64: 1, 8, 32>}, {transform_indices = @transform_2, window_bounds = array<i64: 1, 8, 32>}, {transform_indices = @transform_3, window_bounds = array<i64: 1, 8, 32>}]} {
    %c0_i32 = arith.constant 0 : i32
    %0 = arith.cmpi eq, %arg2, %c0_i32 : i32
    %1 = arith.extui %0 : i1 to i32
    %c0_i32_0 = arith.constant 0 : i32
    %2 = arith.cmpi ne, %1, %c0_i32_0 : i32
    scf.if %2 {
      %cst_25 = arith.constant 0xFF800000 : f32
      %34 = vector.broadcast %cst_25 : f32 to vector<8x1xf32>
      %c0_26 = arith.constant 0 : index
      %c0_27 = arith.constant 0 : index
      %35 = vector.load %arg8[%c0_26, %c0_27] : memref<8x1xf32, #tpu.memory_space<vmem>>, vector<8x1xf32>
      tpu.vector_store %arg8[%c0_26, %c0_27], %34 {strides = array<i32>} : memref<8x1xf32, #tpu.memory_space<vmem>>, vector<8x1xf32>,
      %cst_28 = arith.constant 0.000000e+00 : f32
      %36 = vector.broadcast %cst_28 : f32 to vector<8x1xf32>
      %c0_29 = arith.constant 0 : index
      %c0_30 = arith.constant 0 : index
      %37 = vector.load %arg9[%c0_29, %c0_30] : memref<8x1xf32, #tpu.memory_space<vmem>>, vector<8x1xf32>
      tpu.vector_store %arg9[%c0_29, %c0_30], %36 {strides = array<i32>} : memref<8x1xf32, #tpu.memory_space<vmem>>, vector<8x1xf32>,
      %cst_31 = arith.constant 0.000000e+00 : f32
      %38 = vector.broadcast %cst_31 : f32 to vector<8x32xf32>
      %c0_32 = arith.constant 0 : index
      %c0_33 = arith.constant 0 : index
      %39 = vector.load %arg10[%c0_32, %c0_33] : memref<8x32xf32, #tpu.memory_space<vmem>>, vector<8x32xf32>
      tpu.vector_store %arg10[%c0_32, %c0_33], %38 {strides = array<i32>} : memref<8x32xf32, #tpu.memory_space<vmem>>, vector<8x32xf32>,
      %c0_34 = arith.constant 0 : index
      %c0_35 = arith.constant 0 : index
      %c0_36 = arith.constant 0 : index
      %40 = vector.load %arg4[%c0_34, %c0_35, %c0_36] : memref<1x8x32xf32, #tpu.memory_space<vmem>>, vector<1x8x32xf32>
      %41 = vector.shape_cast %40 : vector<1x8x32xf32> to vector<8x32xf32>
      %cst_37 = arith.constant 0.176776692 : f32
      %42 = vector.broadcast %cst_37 : f32 to vector<8x32xf32>
      %43 = arith.mulf %41, %42 : vector<8x32xf32>
      %c0_38 = arith.constant 0 : index
      %c0_39 = arith.constant 0 : index
      %44 = vector.load %arg11[%c0_38, %c0_39] : memref<8x32xf32, #tpu.memory_space<vmem>>, vector<8x32xf32>
      tpu.vector_store %arg11[%c0_38, %c0_39], %43 {strides = array<i32>} : memref<8x32xf32, #tpu.memory_space<vmem>>, vector<8x32xf32>,
    } else {
    }
    %c0 = arith.constant 0 : index
    %c0_1 = arith.constant 0 : index
    %3 = vector.load %arg11[%c0, %c0_1] : memref<8x32xf32, #tpu.memory_space<vmem>>, vector<8x32xf32>
    %c0_2 = arith.constant 0 : index
    %c0_3 = arith.constant 0 : index
    %c0_4 = arith.constant 0 : index
    %4 = vector.load %arg5[%c0_2, %c0_3, %c0_4] : memref<1x8x32xf32, #tpu.memory_space<vmem>>, vector<1x8x32xf32>
    %5 = vector.shape_cast %4 : vector<1x8x32xf32> to vector<8x32xf32>
    %cst = arith.constant dense<0.000000e+00> : vector<8x8xf32>
    %6 = tpu.matmul %3, %5, %cst {dimension_numbers = #tpu.dot_dimension_numbers<[1], [1], [0], [0], [0, 0, 1, 0], [], []>} : vector<8x32xf32>, vector<8x32xf32>, vector<8x8xf32> -> vector<8x8xf32>
    %c0_5 = arith.constant 0 : index
    %c0_6 = arith.constant 0 : index
    %7 = vector.load %arg8[%c0_5, %c0_6] : memref<8x1xf32, #tpu.memory_space<vmem>>, vector<8x1xf32>
    %cst_7 = arith.constant dense<0xFF800000> : vector<8xf32>
    %8 = vector.multi_reduction <maximumf>, %6, %cst_7 [1] : vector<8x8xf32> to vector<8xf32>
    %9 = vector.shape_cast %8 : vector<8xf32> to vector<8x1xf32>
    %10 = arith.maximumf %7, %9 : vector<8x1xf32>
    %11 = arith.subf %7, %10 : vector<8x1xf32>
    %12 = math.exp %11 : vector<8x1xf32>
    %13 = vector.broadcast %10 : vector<8x1xf32> to vector<8x8xf32>
    %14 = arith.subf %6, %13 : vector<8x8xf32>
    %15 = math.exp %14 : vector<8x8xf32>
    %c0_8 = arith.constant 0 : index
    %c0_9 = arith.constant 0 : index
    %16 = vector.load %arg9[%c0_8, %c0_9] : memref<8x1xf32, #tpu.memory_space<vmem>>, vector<8x1xf32>
    %17 = arith.mulf %12, %16 : vector<8x1xf32>
    %cst_10 = arith.constant dense<0.000000e+00> : vector<8xf32>
    %18 = vector.multi_reduction <add>, %15, %cst_10 [1] : vector<8x8xf32> to vector<8xf32>
    %19 = vector.shape_cast %18 : vector<8xf32> to vector<8x1xf32>
    %20 = arith.addf %17, %19 : vector<8x1xf32>
    %c0_11 = arith.constant 0 : index
    %c0_12 = arith.constant 0 : index
    %21 = vector.load %arg9[%c0_11, %c0_12] : memref<8x1xf32, #tpu.memory_space<vmem>>, vector<8x1xf32>
    tpu.vector_store %arg9[%c0_11, %c0_12], %20 {strides = array<i32>} : memref<8x1xf32, #tpu.memory_space<vmem>>, vector<8x1xf32>,
    %c0_13 = arith.constant 0 : index
    %c0_14 = arith.constant 0 : index
    %22 = vector.load %arg10[%c0_13, %c0_14] : memref<8x32xf32, #tpu.memory_space<vmem>>, vector<8x32xf32>
    %23 = vector.broadcast %12 : vector<8x1xf32> to vector<8x32xf32>
    %24 = arith.mulf %23, %22 : vector<8x32xf32>
    %c0_15 = arith.constant 0 : index
    %c0_16 = arith.constant 0 : index
    %c0_17 = arith.constant 0 : index
    %25 = vector.load %arg6[%c0_15, %c0_16, %c0_17] : memref<1x8x32xf32, #tpu.memory_space<vmem>>, vector<1x8x32xf32>
    %26 = vector.shape_cast %25 : vector<1x8x32xf32> to vector<8x32xf32>
    %cst_18 = arith.constant dense<0.000000e+00> : vector<8x32xf32>
    %27 = tpu.matmul %15, %26, %cst_18 {dimension_numbers = #tpu.dot_dimension_numbers<[1], [0], [0], [1], [0, 0, 1, 1], [], []>} : vector<8x8xf32>, vector<8x32xf32>, vector<8x32xf32> -> vector<8x32xf32>
    %28 = arith.addf %24, %27 : vector<8x32xf32>
    %c0_19 = arith.constant 0 : index
    %c0_20 = arith.constant 0 : index
    %29 = vector.load %arg10[%c0_19, %c0_20] : memref<8x32xf32, #tpu.memory_space<vmem>>, vector<8x32xf32>
    tpu.vector_store %arg10[%c0_19, %c0_20], %28 {strides = array<i32>} : memref<8x32xf32, #tpu.memory_space<vmem>>, vector<8x32xf32>,
    %c0_21 = arith.constant 0 : index
    %c0_22 = arith.constant 0 : index
    %30 = vector.load %arg8[%c0_21, %c0_22] : memref<8x1xf32, #tpu.memory_space<vmem>>, vector<8x1xf32>
    tpu.vector_store %arg8[%c0_21, %c0_22], %10 {strides = array<i32>} : memref<8x1xf32, #tpu.memory_space<vmem>>, vector<8x1xf32>,
    %c0_i32_23 = arith.constant 0 : i32
    %31 = arith.cmpi eq, %arg2, %c0_i32_23 : i32
    %32 = arith.extui %31 : i1 to i32
    %c0_i32_24 = arith.constant 0 : i32
    %33 = arith.cmpi ne, %32, %c0_i32_24 : i32
    scf.if %33 {
      %c0_25 = arith.constant 0 : index
      %c0_26 = arith.constant 0 : index
      %34 = vector.load %arg9[%c0_25, %c0_26] : memref<8x1xf32, #tpu.memory_space<vmem>>, vector<8x1xf32>
      %35 = tpu.reciprocal %34 : vector<8x1xf32> -> vector<8x1xf32>
      %c0_27 = arith.constant 0 : index
      %c0_28 = arith.constant 0 : index
      %36 = vector.load %arg10[%c0_27, %c0_28] : memref<8x32xf32, #tpu.memory_space<vmem>>, vector<8x32xf32>
      %37 = vector.broadcast %35 : vector<8x1xf32> to vector<8x32xf32>
      %38 = arith.mulf %36, %37 : vector<8x32xf32>
      %c0_29 = arith.constant 0 : index
      %c0_30 = arith.constant 0 : index
      %c0_31 = arith.constant 0 : index
      %39 = vector.load %arg7[%c0_29, %c0_30, %c0_31] : memref<1x8x32xf32, #tpu.memory_space<vmem>>, vector<1x8x32xf32>
      %40 = vector.shape_cast %39 : vector<1x8x32xf32> to vector<8x32xf32>
      %41 = vector.shape_cast %38 : vector<8x32xf32> to vector<1x8x32xf32>
      tpu.vector_store %arg7[%c0_29, %c0_30, %c0_31], %41 {strides = array<i32>} : memref<1x8x32xf32, #tpu.memory_space<vmem>>, vector<1x8x32xf32>,
    } else {
    }
    return
  }
  func.func @transform_0(%arg0: i32, %arg1: i32, %arg2: i32, %arg3: memref<1xi32, #tpu.memory_space<smem>>) -> (i32, i32, i32) {
    %c0_i32 = arith.constant 0 : i32
    %c0_i32_0 = arith.constant 0 : i32
    return %arg0, %arg1, %c0_i32 : i32, i32, i32
  }
  func.func @transform_1(%arg0: i32, %arg1: i32, %arg2: i32, %arg3: memref<1xi32, #tpu.memory_space<smem>>) -> (i32, i32, i32) {
    %c0_i32 = arith.constant 0 : i32
    %c0_i32_0 = arith.constant 0 : i32
    return %arg0, %arg2, %c0_i32 : i32, i32, i32
  }
  func.func @transform_2(%arg0: i32, %arg1: i32, %arg2: i32, %arg3: memref<1xi32, #tpu.memory_space<smem>>) -> (i32, i32, i32) {
    %c0_i32 = arith.constant 0 : i32
    %c0_i32_0 = arith.constant 0 : i32
    return %arg0, %arg2, %c0_i32 : i32, i32, i32
  }
  func.func @transform_3(%arg0: i32, %arg1: i32, %arg2: i32, %arg3: memref<1xi32, #tpu.memory_space<smem>>) -> (i32, i32, i32) {
    %c0_i32 = arith.constant 0 : i32
    %c0_i32_0 = arith.constant 0 : i32
    return %arg0, %arg1, %c0_i32 : i32, i32, i32
  }
}

</mosaic_0001>

<bundles_post_ra>
// kernel: tpu_custom_call.1
= control target key start
LH: loop header
LB: loop body
LE: loop exit
PB: predicated region body
PF: predicated region fallthrough
CT: control target
= control target key end

     0   :  { %s1253_s0 = inlined_call_operand.<no memory space> [shape: s32[1], index: 0, kind: input, shape index: {}]   ;;  %s1254_s1 = inlined_call_operand.hbm [shape: f32[2,8,32], index: 1, kind: input, shape index: {}]   ;;  %s1255_s2 = inlined_call_operand.hbm [shape: f32[2,8,32], index: 2, kind: input, shape index: {}]   ;;  %s1256_s3 = inlined_call_operand.hbm [shape: f32[2,8,32], index: 3, kind: input, shape index: {}]   ;;  %s1257_s4 = inlined_call_operand.hbm [shape: f32[2,8,32], index: 4, kind: output, shape index: {}]  }
   0x1   :  { %1263 = sst [smem:[#allocation21_spill]] %s1255_s2 }
   0x2   :  { %10 = vsyncpa [#allocation9], 0 }
   0x3   :  { %12 = vsyncpa [#allocation9 + $0x1], 0 }
   0x4   :  { %13 = vsyncpa [#allocation12], 0 }
   0x5   :  { %15 = vsyncpa [#allocation12 + $0x1], 0 }
   0x6   :  { %16 = vsyncpa [#allocation10], 0 }
   0x7   :  { %18 = vsyncpa [#allocation10 + $0x1], 0  ;;  %s976_s15 = smov 0   ;;  %s978_s0 = smov 0  }
   0x8   :  { %s980_s16 = smov 0   ;;  %s982_s17 = smov 0  }
   0x9   :  { %s984_s18 = smov 0   ;;  %s986_s19 = smov 0  }
   0xa LB: > { %1264 = sst [smem:[#allocation18_spill]] %s937_s18  ;;  %s1007_s20 = sadd.s32 4294967295, %s941_s19   ;;  %s941_s19 = sphi %s986_s19, %s24_s19   ;;  %s937_s18 = sphi %s984_s18, %s1285_s18   ;;  %s933_s17 = sphi %s982_s17, %s1284_s17   ;;  %s929_s16 = sphi %s980_s16, %s1288_s16   ;;  %s925_s0 = sphi %s978_s0, %s1287_s0   ;;  %s921_s15 = sphi %s976_s15, %s1286_s15  }
   0xb   : > { %s646_s21 = sadd.s32 4294967294, %s941_s19   ;;  %s43_s22 = sadd.s32 1, %s937_s18 }
   0xc   : > { %s52_s23 = sadd.s32 1, %s929_s16  ;;  %p45_p0 = scmp.ge.s32.totalorder %s43_s22, 2 }
   0xd   : > { %p59_p1 = scmp.ne.s32.totalorder %s929_s16, %s925_s0  ;;  %p60_p2 = scmp.eq.s32.totalorder %s941_s19, 0 }
   0xe   : > { %p65_p3 = scmp.ne.s32.totalorder %s925_s0, %s921_s15  ;;  %s1290_s22 = smov (%p45_p0, %s43_s22), 0 }
   0xf   : > { %1265 = sst [smem:[#allocation19_spill]] %s1290_s22  ;;  %p1019_p4 = por %p60_p2, %p59_p1 }
  0x10   : > { %p66_p5 = scmp.eq.s32.totalorder %s1007_s20, 0  ;;  %s47_s25 = ssub.s32 %s937_s18, %s1290_s22 }
  0x11   : > { %p147_p6 = scmp.eq.s32.totalorder %s1007_s20, 1  ;;  %p50_p7 = scmp.eq.s32.totalorder %s47_s25, 0 }
  0x12   : > { %p1027_p8 = por %p66_p5, %p65_p3  ;;  %p153_p10 = scmp.eq.s32.totalorder %s646_s21, 1 }
  0x13   : > { %p1031_p9 = por %p147_p6, %p59_p1  ;;  %p703_p13 = scmp.lt.s32.totalorder %s941_s19, 2 }
  0x14   : > { %s1267_s26 = scalar_select %p1027_p8, 1, 0 }
  0x15   : > { %s1268_s27 = scalar_select %p1031_p9, 1, 0 }
  0x16   : > { %s1036_s28 = scalar_select %p50_p7, %s929_s16, %s52_s23  }
  0x17   : > { %p1038_p11 = por %p153_p10, %p65_p3  ;;  %s173_s30 = sand.u32 1, %s929_s16  }
  0x18   : > { %1269 = sst [smem:[#allocation20_spill]] %s1036_s28  ;;  %s1047_s5 = sshll.u32 %s173_s30, 3 }
  0x19   : > { %s1270_s29 = scalar_select %p1038_p11, 1, 0 }
  0x1a   : > { %s1050_s6 = sshll.u32 %s937_s18, 7  ;;  %p1054_p0 = pnand %p703_p13, %p1019_p4 }
  0x1b   : > { %s192_s8 = sand.u32 1, %s941_s19   ;;  %s1272_s2 = sld [smem:[#allocation21_spill]] }
  0x1c   : > { %s1271_s7 = scalar_select %p1054_p0, 1, 0 }
  0x1d   : > { %s196_s12 = scalar_lea.vmem [#allocation11], %s1047_s5  ;;  %s1070_s14 = scalar_lea.sflag [#allocation12], %s192_s8 }
  0x1e   : > { %s204_s13 = sshll.u32 %s196_s12, 4  ;;  %p1076_p4 = pneg %p1054_p0  ;;  %s1067_s13 = int_to_ptr.vmem [resolvable:$true] %s204_s13 }
  0x21   : > { %s1063_s11 = scalar_lea.hbm %s1272_s2, %s1050_s6  ;;  %s770_s9 = scalar_lea.hbm %s1272_s2, 256 }
  0x22   : > { %s765_s21 = scalar_lea.hbm %s1063_s11, 128  ;;  %p771_p7 = scmp.lt.u32.totalorder %s1063_s11, %s1272_s2 }
  0x23   : > { %p766_p3 = scmp.ne.s32.totalorder %s1063_s11, %s765_s21  ;;  %p772_p10 = scmp.lt.u32.totalorder %s770_s9, %s765_s21 }
  0x24   : > { %p774_p12 = scmp.lt.u32.totalorder %s765_s21, %s1063_s11 }
  0x25   : > { %p768_p5 = pnand %p1076_p4, %p766_p3  ;;  %p773_p13 = por %p772_p10, %p771_p7 }
  0x27   : > { %p769_p6 = pneg %p768_p5  ;;  %p775_p1 = por %p774_p12, %p773_p13 }
  0x29   : > { %p776_p2 = pnand %p775_p1, %p769_p6 }
  0x2b   : > { %779 = shalt.err (!%p776_p2)
}
  0x2c   : > { %s780_s8 = scalar_lea.vmem %s1067_s13, 128  ;;  %s943_s24 = smov [#allocation11]  }
  0x2d   : > { %p781_p3 = scmp.ne.s32.totalorder %s1067_s13, %s780_s8  ;;  %s785_s25 = sshll.u32 %s943_s24, 4  ;;  %s786_s25 = int_to_ptr.vmem [resolvable:$false] %s785_s25 }
  0x2e   : > { %s787_s10 = scalar_lea.vmem %s786_s25, 256  ;;  %p788_p9 = scmp.lt.s32.totalorder %s1067_s13, %s786_s25 }
  0x2f   : > { %p783_p5 = pnand %p781_p3, %p1076_p4  ;;  %p789_p8 = scmp.lt.s32.totalorder %s787_s10, %s780_s8 }
  0x31   : > { %p784_p11 = pneg %p783_p5  ;;  %p790_p7 = por %p789_p8, %p788_p9 }
  0x33   : > { %p791_p10 = pnand %p790_p7, %p784_p11 }
  0x35   : > { %794 = shalt.err (!%p791_p10)
}
  0x36   : > { %695 = dma.hbm_to_vmem [thread:$0]  (!%p1054_p0), %s1063_s11, 128, %s1067_s13, %s1070_s14  }
  0x37   : > { %p1274_p12 = scmp.lt.s32.totalorder %s941_s19, 3  ;;  %p1275_p1 = scmp.ge.s32.totalorder %s941_s19, 1 }
  0x38   : > { %s1112_s8 = scalar_lea.hbm %s1254_s1, %s1050_s6  ;;  %s177_s24 = scalar_lea.vmem [#allocation8], %s1047_s5 }
  0x39   : > { %p1104_p2 = pnand %p1275_p1, %p1274_p12  ;;  %s185_s25 = sshll.u32 %s177_s24, 4  ;;  %s1115_s25 = int_to_ptr.vmem [resolvable:$true] %s185_s25 }
  0x3a   : > { %s1121_s10 = scalar_lea.hbm %s1256_s3, %s1050_s6  ;;  %s174_s2 = scalar_lea.sflag [#allocation9], %s173_s30 }
  0x3b   : > { %s1276_s21 = scalar_select %p1104_p2, 1, 0 }
  0x3c   : > { %s795_s22 = scalar_lea.hbm %s1112_s8, 128  ;;  %s800_s18 = scalar_lea.hbm %s1254_s1, 256 }
  0x3d   : > { %p796_p8 = scmp.ne.s32.totalorder %s1112_s8, %s795_s22  ;;  %p801_p6 = scmp.lt.u32.totalorder %s1112_s8, %s1254_s1 }
  0x3e   : > { %p802_p13 = scmp.lt.u32.totalorder %s800_s18, %s795_s22  ;;  %p804_p5 = scmp.lt.u32.totalorder %s795_s22, %s1112_s8 }
  0x3f   : > { %p798_p9 = pnand %p796_p8, %p1076_p4 }
  0x40   : > { %p803_p3 = por %p802_p13, %p801_p6 }
  0x41   : > { %p799_p11 = pneg %p798_p9 }
  0x42   : > { %p805_p7 = por %p804_p5, %p803_p3 }
  0x44   : > { %p806_p10 = pnand %p805_p7, %p799_p11 }
  0x46   : > { %809 = shalt.err (!%p806_p10)
}
  0x47   : > { %s810_s30 = scalar_lea.vmem %s1115_s25, 128  ;;  %s944_s6 = smov [#allocation8]  }
  0x48   : > { %p811_p12 = scmp.ne.s32.totalorder %s1115_s25, %s810_s30  ;;  %s815_s11 = sshll.u32 %s944_s6, 4  ;;  %s816_s11 = int_to_ptr.vmem [resolvable:$false] %s815_s11 }
  0x49   : > { %s817_s28 = scalar_lea.vmem %s816_s11, 256  ;;  %p818_p9 = scmp.lt.s32.totalorder %s1115_s25, %s816_s11 }
  0x4a   : > { %p813_p1 = pnand %p811_p12, %p1076_p4  ;;  %p819_p2 = scmp.lt.s32.totalorder %s817_s28, %s810_s30 }
  0x4c   : > { %p814_p8 = pneg %p813_p1  ;;  %p820_p6 = por %p819_p2, %p818_p9 }
  0x4e   : > { %p821_p13 = pnand %p820_p6, %p814_p8 }
  0x50   : > { %824 = shalt.err (!%p821_p13)
}
  0x51   : > { %692 = dma.hbm_to_vmem [thread:$0]  (!%p1054_p0), %s1112_s8, 128, %s1115_s25, %s174_s2  }
  0x52   : > { %s215_s18 = scalar_lea.vmem [#allocation13], %s1047_s5  ;;  %s825_s13 = scalar_lea.hbm %s1121_s10, 128 }
  0x53   : > { %s223_s22 = sshll.u32 %s215_s18, 4  ;;  %p826_p11 = scmp.ne.s32.totalorder %s1121_s10, %s825_s13  ;;  %s224_s22 = int_to_ptr.vmem [resolvable:$true] %s223_s22 }
  0x54   : > { %s830_s24 = scalar_lea.hbm %s1256_s3, 256  ;;  %p831_p5 = scmp.lt.u32.totalorder %s1121_s10, %s1256_s3 }
  0x55   : > { %p828_p2 = pnand %p826_p11, %p1076_p4  ;;  %p832_p7 = scmp.lt.u32.totalorder %s830_s24, %s825_s13 }
  0x56   : > { %p834_p12 = scmp.lt.u32.totalorder %s825_s13, %s1121_s10 }
  0x57   : > { %p829_p3 = pneg %p828_p2  ;;  %p833_p10 = por %p832_p7, %p831_p5 }
  0x59   : > { %p835_p1 = por %p834_p12, %p833_p10 }
  0x5b   : > { %p836_p8 = pnand %p835_p1, %p829_p3 }
  0x5d   : > { %839 = shalt.err (!%p836_p8)
}
  0x5e   : > { %s840_s2 = scalar_lea.vmem %s224_s22, 128  ;;  %s945_s5 = smov [#allocation13]  }
  0x5f   : > { %p841_p9 = scmp.ne.s32.totalorder %s224_s22, %s840_s2  ;;  %s845_s8 = sshll.u32 %s945_s5, 4  ;;  %s846_s8 = int_to_ptr.vmem [resolvable:$false] %s845_s8 }
  0x60   : > { %s847_s25 = scalar_lea.vmem %s846_s8, 256  ;;  %p848_p11 = scmp.lt.s32.totalorder %s224_s22, %s846_s8 }
  0x61   : > { %p843_p6 = pnand %p841_p9, %p1076_p4  ;;  %p849_p2 = scmp.lt.s32.totalorder %s847_s25, %s840_s2 }
  0x63   : > { %p844_p13 = pneg %p843_p6  ;;  %p850_p0 = por %p849_p2, %p848_p11 }
  0x65   : > { %p851_p5 = pnand %p850_p0, %p844_p13 }
  0x67   : > { %854 = shalt.err (!%p851_p5)
}
  0x68   : > { %p1277_p7 = scmp.ne.s32.totalorder %s1271_s7, 0  ;;  %p1278_p3 = scmp.ne.s32.totalorder %s1276_s21, 0 }
  0x69   : > { %s1168_s23 = sand.u32 (!%p1278_p3), 1, %s925_s0   ;;  %p1279_p0 = scmp.ne.s32.totalorder (!%p1278_p3), %s1267_s26, 0 }
  0x6a   : > { %698 = dma.hbm_to_vmem [thread:$0]  (!%p1277_p7), %s1121_s10, 128, %s224_s22, %s1070_s14  }
  0x6b   : > { %232 = sbr.rel (%p1278_p3) target bundleno = 937 (0x3a9), region = 32  ;;  %s1171_s11 = sshll.u32 (!%p1278_p3), %s1168_s23, 3 }
  0x6c   : > { %s235_s28 = scalar_lea.sflag (!%p1278_p3), [#allocation9], %s1168_s23  ;;  %s238_s18 = scalar_lea.vmem (!%p1278_p3), [#allocation8], %s1171_s11 }
  0x72   : > { %908 = dma.done.wait (%p1279_p0), %s235_s28, 128  }
  0x73   : > { %910 = vsyncadd (%p1279_p0), %s235_s28, 4294967168  ;;  %s243_s7 = sand.u32 1, %s1007_s20   ;;  %s247_s21 = scalar_lea.vmem [#allocation11], %s1171_s11 }
  0x74   : > { %s244_s14 = scalar_lea.sflag [#allocation12], %s243_s7 }
  0x75   : > { %912 = dma.done.wait (%p1279_p0), %s244_s14, 256  }
  0x76   : > { %914 = vsyncadd (%p1279_p0), %s244_s14, 4294967040  ;;  %vm296_vm0 = vcmask 261120   ;;  %v946_v0 = vmov 0.0   ;;  %vm947_vm1 = vmmov 0   ;;  %v298_v1 = vld [vmem:[%s238_s18] sm:$0xff]  ;;  %v302_v2 = vld [vmem:[%s247_s21] sm:$0xff] }
  0x77   : > { %671 = vmatprep.subr.mxu0 %v946_v0  ;;  %297 = vst.msk [vmem:[#allocation4] sm:$0xff] %vm296_vm0, %v946_v0  ;;  %673 = vmatprep.mubr.msk.f32.mxu0 %vm947_vm1, %v946_v0  ;;  %v299_v3 = vmul.f32 0.17677669, %v298_v1  ;;  %vm293_vm2 = vcmask 7168   ;;  %v948_v5 = vmov -inf   ;;  %vm381_vm3 = vcmask 64512  }
  0x78   : > { %676 = vmatprep.subr.mxu1 %v946_v0  ;;  %678 = vmatprep.mubr.msk.f32.mxu1 %vm947_vm1, %v946_v0  ;;  %294 = vst.msk [vmem:[#allocation2] sm:$0xff] %vm293_vm2, %v948_v5  ;;  %295 = vst.msk [vmem:[#allocation3] sm:$0xff] %vm293_vm2, %v946_v0  ;;  %v949_v9 = vmov 0   ;;  %s256_s20 = scalar_lea.vmem [#allocation13], %s1171_s11  ;;  %s664_s26 = sshll.u32 %s933_s17, 7 }
  0x79   : > { %672 = vmatpush3.xpose.msk.msra.mxu0 %vm296_vm0, %v302_v2  ;;  %300 = vst.msk [vmem:[#allocation5] sm:$0xff] %vm296_vm0, %v299_v3  ;;  %757 = vset.pattern.permute.xlu0 %v949_v9  ;;  %v412_v14 = vld [vmem:[%s256_s20] sm:$0xff]  ;;  %s288_s10 = scalar_lea.vmem [#allocation14], %s1171_s11  ;;  %s1203_s12 = scalar_lea.hbm %s1257_s4, %s664_s26 }
  0x7a   : > { %758 = vset.pattern.permute.xlu1 %v949_v9  ;;  %677 = vmatpush3.msra.mxu1 %v412_v14  ;;  %s517_s22 = sshll.u32 %s288_s10, 4  ;;  %s503_s24 = scalar_lea.sflag [#allocation10], %s1168_s23  ;;  %s1205_s22 = int_to_ptr.vmem [resolvable:$true] %s517_s22 }
  0x7b   : > { %s855_s30 = scalar_lea.vmem %s1205_s22, 128  ;;  %p1280_p10 = scmp.ne.s32.totalorder %s1268_s27, 0 }
  0x7c   : > { %p856_p4 = scmp.ne.s32.totalorder %s1205_s22, %s855_s30  ;;  %s950_s17 = smov [#allocation14]  }
  0x7d   : > { %s859_s6 = sshll.u32 %s950_s17, 4  ;;  %s860_s6 = int_to_ptr.vmem [resolvable:$false] %s859_s6 }
  0x7e   : > { %v405_v28 = vld [vmem:[#allocation4] sm:$0xff]  ;;  %p857_p12 = pnand %p856_p4, %p1280_p10  ;;  %s861_s2 = scalar_lea.vmem %s860_s6, 256 }
  0x7f   : > { %v380_v10 = vld [vmem:[#allocation2] sm:$0xff]  ;;  %v397_v22 = vld [vmem:[#allocation3] sm:$0xff]  ;;  %p862_p8 = scmp.lt.s32.totalorder %s1205_s22, %s860_s6  ;;  %p863_p9 = scmp.lt.s32.totalorder %s861_s2, %s855_s30 }
  0x80   : > { %v301_v4 = vld [vmem:[#allocation5] sm:$0xff]  ;;  %p858_p1 = pneg %p857_p12 }
  0x81   : > { %674 = vmatmul.mubr.msk.f32.vlgmr.msra.gmra.mrb[0].mxu0 %vm296_vm0, %v301_v4  ;;  %p864_p6 = por %p863_p9, %p862_p8 }
  0x83   : > { %p865_p13 = pnand %p864_p6, %p858_p1 }
 0x154   : > { %v376_v6 = vpop.f32.mrb[0].mxu0 }
 0x155   : > { %v675_v7 = vpop.f32.mrb[1].mxu0  ;;  %v382_v8 = vsel %vm381_vm3, %v376_v6, -inf }
 0x156   : > { %383 = vmax.xlane.f32.xlu0 %v382_v8 }
 0x1e3   : > { %v384_v11 = vpop.xlane.xlu0 %383 }
 0x1e4   : > { %v385_v12 = vmax.f32 %v380_v10, %v384_v11 }
 0x1e6   : > { %v386_v13 = vsub.f32 %v380_v10, %v385_v12  ;;  %488 = vst.msk [vmem:[#allocation2] sm:$0xff] %vm293_vm2, %v385_v12  ;;  %391 = vperm.xlu0 %757, %v385_v12  }
 0x1e8   : > { %v387_v20 = vmul.f32 1.442695, %v386_v13 }
 0x265   : > { %v392_v15 = vpop.permute.xlu0 %391 }
 0x266   : > { %v394_v16 = vsub.f32 %v376_v6, %v392_v15 }
 0x268   : > { %v395_v17 = vmul.f32 1.442695, %v394_v16 }
 0x26a   : > { %759 = vpow2.f32 %v395_v17 }
 0x26b   : > { %761 = vpow2.f32 %v387_v20 }
 0x274   : > { %v760_v18 = vpop.eup %759 }
 0x275   : > { %679 = vmatmul.mubr.msk.f32.vlgmr.msra.gmra.mrb[0].mxu1 %vm381_vm3, %v760_v18  ;;  %v399_v19 = vsel %vm381_vm3, %v760_v18, 0.0  ;;  %v762_v21 = vpop.eup %761 }
 0x276   : > { %400 = vadd.xlane.f32.xlu1 %v399_v19  ;;  %v398_v23 = vmul.f32 %v762_v21, %v397_v22 }
 0x287   : > { %408 = vperm.xlu1 %758, %v762_v21  }
 0x303   : > { %v401_v24 = vpop.xlane.xlu1 %400 }
 0x304   : > { %v402_v25 = vadd.f32 %v401_v24, %v398_v23 }
 0x306   : > { %404 = vst.msk [vmem:[#allocation3] sm:$0xff] %vm293_vm2, %v402_v25 }
 0x307   : > { %v409_v29 = vpop.permute.xlu1 %408 }
 0x308   : > { %v411_v30 = vmul.f32 %v409_v29, %v405_v28 }
 0x30d   : > { %v492_v26 = vld [vmem:[#allocation3] sm:$0xff] }
 0x30e   : > { %763 = vrcp.f32 %v492_v26 }
 0x318   : > { %v764_v27 = vpop.eup %763 }
 0x319   : > { %497 = vperm.xlu1 %758, %v764_v27  }
 0x348   : > { %v482_v31 = vpop.f32.mrb[0].mxu1 }
 0x349   : > { %v486_v32 = vadd.f32 %v482_v31, %v411_v30  ;;  %v680_v33 = vpop.f32.mrb[1].mxu1 }
 0x34b   : > { %487 = vst.msk [vmem:[#allocation4] sm:$0xff] %vm296_vm0, %v486_v32 }
 0x352   : > { %v494_v34 = vld [vmem:[#allocation4] sm:$0xff] }
 0x398   : > { %v498_v35 = vpop.permute.xlu1 %497 }
 0x399   : > { %v500_v36 = vmul.f32 %v498_v35, %v494_v34 }
 0x39b   : > { %501 = vst.msk [vmem:[%s288_s10] sm:$0xff] %vm296_vm0, %v500_v36 }
 0x39c   : > { %868 = shalt.err (!%p865_p13)
}
 0x39d   : > { %s869_s5 = scalar_lea.hbm %s1203_s12, 128  ;;  %s873_s23 = scalar_lea.hbm %s1257_s4, 256 }
 0x39e   : > { %p870_p11 = scmp.ne.s32.totalorder %s1203_s12, %s869_s5  ;;  %p874_p7 = scmp.lt.u32.totalorder %s1203_s12, %s1257_s4 }
 0x39f   : > { %p875_p3 = scmp.lt.u32.totalorder %s873_s23, %s869_s5  ;;  %p877_p4 = scmp.lt.u32.totalorder %s869_s5, %s1203_s12 }
 0x3a0   : > { %p871_p2 = pnand %p870_p11, %p1280_p10 }
 0x3a1   : > { %p876_p0 = por %p875_p3, %p874_p7 }
 0x3a2   : > { %p872_p5 = pneg %p871_p2 }
 0x3a3   : > { %p878_p12 = por %p877_p4, %p876_p0 }
 0x3a5   : > { %p879_p1 = pnand %p878_p12, %p872_p5 }
 0x3a7   : > { %882 = shalt.err (!%p879_p1)
}
 0x3a8   : > { %687 = dma.vmem_to_hbm [thread:$0]  (%p1280_p10), %s1205_s22, 128, %s1203_s12, %s503_s24  }
 0x3a9 PF: > { %s529_s18 = sand.u32 1, %s921_s15   ;;  %p1281_p8 = scmp.ne.s32.totalorder %s1270_s29, 0 }
 0x3aa   : > { %p1282_p9 = scmp.ge.s32.totalorder %s941_s19, 2  ;;  %s530_s7 = scalar_lea.sflag [#allocation10], %s529_s18 }
 0x3ac   : > { %p700_p6 = pnand %p1282_p9, %p1281_p8 }
 0x3ae   : > { %916 = dma.done.wait (!%p700_p6), %s530_s7, 128  }
 0x3af   : > { %918 = vsyncadd (!%p700_p6), %s530_s7, 4294967168  ;;  %s24_s19 = sadd.s32 1, %s941_s19   ;;  %s1283_s27 = sld [smem:[#allocation20_spill]] }
 0x3b0   : > { %p21_p13 = scmp.ge.s32.totalorder %s24_s19, 4   ;;  %s1284_s17 = sld [smem:[#allocation18_spill]] }
 0x3b1   : > { %s1285_s18 = sld [smem:[#allocation19_spill]]  ;;  %s1286_s15 = smov %s925_s0 }
 0x3b2   : > { %s1287_s0 = smov %s929_s16  ;;  %23 = sbr.rel (!%p21_p13) target bundleno = 10 (0xa), region = 109 }
 0x3b5   : > { %s1288_s16 = smov %s1283_s27 }
 0x3b9   :  { %535 = vsyncpa [#allocation9], 1 }
 0x3ba   :  { %537 = vsyncpa [#allocation9 + $0x1], 1 }
 0x3bb   :  { %538 = vsyncpa [#allocation12], 1 }
 0x3bc   :  { %540 = vsyncpa [#allocation12 + $0x1], 1 }
 0x3bd   :  { %541 = vsyncpa [#allocation10], 1 }
 0x3be   :  { %543 = vsyncpa [#allocation10 + $0x1], 1 }

</bundles_post_ra>
